<compile_context>
chip_gen: v7x
topology: tpu7x:2x2x1
jax: 0.10.0
libtpu: 0.0.40
codegen_flags: <defaults>
</compile_context>

<pallas_src>
import jax
import jax.numpy as jnp
from jax.experimental import pallas as pl
from jax.experimental.pallas import tpu as pltpu


_LANE = 128
_SUBLANE = 8
_MAX_TM = 256
_MAX_TN = 1024
_MAX_TK = 1024
_COMPUTE_DTYPE = jnp.bfloat16
_VMEM_LIMIT_BYTES = 48 * 1024 * 1024  # safe on v7x (64 MiB), > v5e 16 MiB default


def _round_up(x, m):
    return (x + m - 1) // m * m


def _cdiv(a, b):
    return (a + b - 1) // b


def _pick_tile(dim, max_tile, align):
    """Largest aligned tile <= max_tile, preferring one that divides the
    aligned dim exactly (so padding is a no-op)."""
    dim_aligned = _round_up(dim, align)
    t = min(max_tile, dim_aligned)
    floor = max(align, t // 2)
    for cand in range(t, floor - 1, -align):
        if dim_aligned % cand == 0:
            return cand
    return t


def _pad2(arr, rows, cols, dtype):
    a = arr.astype(dtype)
    pr, pc = rows - a.shape[0], cols - a.shape[1]
    if pr or pc:
        a = jnp.pad(a, ((0, pr), (0, pc)))
    return a


# --------------------------------------------------------------------------- #
# Kernel: one (tm, tn) output tile, accumulated over the K (H_in) grid axis.  #
#   acc_ref : f32 (tm, tn) accumulator scratch, persistent across k.          #
#   xa_ref  : bf16 (tm, r_pad) precomputed x@A tile (input, M-indexed only).  #
# --------------------------------------------------------------------------- #
def _lora_linear_kernel(x_ref, w_ref, xa_ref, b_ref, o_ref, acc_ref):
    k = pl.program_id(2)
    nk = pl.num_programs(2)

    prod = jnp.dot(x_ref[...], w_ref[...],
                   preferred_element_type=jnp.float32)        # [tm, tn] f32

    @pl.when(k == 0)
    def _():
        # Direct write: saves the zero-init store + re-read of zeros.
        acc_ref[...] = prod

    @pl.when(k > 0)
    def _():
        acc_ref[...] += prod

    @pl.when(k == nk - 1)
    def _():
        # LoRA epilogue (scale already folded into B in preprocessing).
        lora = jnp.dot(xa_ref[...], b_ref[...],
                       preferred_element_type=jnp.float32)    # [tm, tn] f32
        o_ref[...] = (acc_ref[...] + lora).astype(o_ref.dtype)


# --------------------------------------------------------------------------- #
# Static (per-model) weight preprocessing: cast to bf16, pad, pick col tiles. #
# --------------------------------------------------------------------------- #
def prepare_lora_operands(w_t, a_t, b_scaled_t):
    """w_t: [H_in, H_out], a_t: [H_in, r], b_scaled_t: [r, H_out] (scale folded)."""
    H_in, H_out = w_t.shape
    r = a_t.shape[1]

    tn = _pick_tile(H_out, _MAX_TN, _LANE)
    tk = _pick_tile(H_in, _MAX_TK, _LANE)
    r_pad = _round_up(r, _LANE)
    N_pad = _round_up(H_out, tn)
    K_pad = _round_up(H_in, tk)

    return {
        "H_in": H_in, "H_out": H_out, "r": r,
        "tn": tn, "tk": tk, "r_pad": r_pad, "N_pad": N_pad, "K_pad": K_pad,
        "w_p": _pad2(w_t, K_pad, N_pad, _COMPUTE_DTYPE),        # [K_pad, N_pad]
        "a_bf16": a_t.astype(_COMPUTE_DTYPE),                   # [H_in, r]
        "b_p": _pad2(b_scaled_t, r_pad, N_pad, _COMPUTE_DTYPE), # [r_pad, N_pad]
    }


def lora_linear_prepared(x2d, prep, *, out_dtype=None):
    """Fused  out = x @ W_t + (x @ A_t) @ B_scaled_t  using preprocessed weights."""
    M, H_in = x2d.shape
    assert H_in == prep["H_in"]
    H_out, r = prep["H_out"], prep["r"]
    tn, tk = prep["tn"], prep["tk"]
    r_pad, N_pad, K_pad = prep["r_pad"], prep["N_pad"], prep["K_pad"]
    out_dtype = out_dtype or x2d.dtype

    # Balanced row tiling: minimize padding when M is just above a multiple of 256.
    n_m_blocks = _cdiv(M, _MAX_TM)
    tm = _round_up(_cdiv(M, n_m_blocks), _SUBLANE)
    M_pad = _round_up(M, tm)

    x_c = x2d.astype(_COMPUTE_DTYPE)
    x_p = _pad2(x_c, M_pad, K_pad, _COMPUTE_DTYPE)

    # Hoisted low-rank projection (tiny: M x H_in x r), fed to the kernel as an
    # input indexed only by the M grid axis.
    xa = jnp.dot(x_c, prep["a_bf16"], preferred_element_type=jnp.float32)
    xa_p = _pad2(xa.astype(_COMPUTE_DTYPE), M_pad, r_pad, _COMPUTE_DTYPE)

    grid = (M_pad // tm, N_pad // tn, K_pad // tk)

    # Deeper W pipeline only for small-M (decode-like) shapes with enough steps.
    w_spec_kwargs = {}
    if grid[0] == 1 and tm <= 32 and grid[1] * grid[2] >= 3:
        w_spec_kwargs["pipeline_mode"] = pl.Buffered(3)

    out_p = pl.pallas_call(
        _lora_linear_kernel,
        out_shape=jax.ShapeDtypeStruct((M_pad, N_pad), out_dtype),
        grid_spec=pltpu.PrefetchScalarGridSpec(
            num_scalar_prefetch=0,
            grid=grid,
            in_specs=[
                pl.BlockSpec((tm, tk), lambda i, n, k: (i, k)),           # x
                pl.BlockSpec((tk, tn), lambda i, n, k: (k, n),            # W
                             **w_spec_kwargs),
                pl.BlockSpec((tm, r_pad), lambda i, n, k: (i, 0)),        # x@A
                pl.BlockSpec((r_pad, tn), lambda i, n, k: (0, n)),        # B (scaled)
            ],
            out_specs=pl.BlockSpec((tm, tn), lambda i, n, k: (i, n)),
            scratch_shapes=[
                pltpu.VMEM((tm, tn), jnp.float32),   # base+lora accumulator
            ],
        ),
        compiler_params=pltpu.CompilerParams(
            # No cross-tile dependencies on M or N anymore -> both parallel
            # (lets v7x shard over its 2 TensorCores); K is the reduction.
            dimension_semantics=("parallel", "parallel", "arbitrary"),
            vmem_limit_bytes=_VMEM_LIMIT_BYTES,
        ),
    )(x_p, prep["w_p"], xa_p, prep["b_p"])

    return out_p[:M, :H_out]


# --------------------------------------------------------------------------- #
# Synthetic wrapped model: one LoRA-adapted linear over inputs_embeds.        #
# --------------------------------------------------------------------------- #
class LoRAModel:

    def __init__(self, hidden, out_dim, rank, alpha, key):
        k_w, k_a = jax.random.split(key)
        # PyTorch nn.Linear convention: weight is [out, in].
        self.weight = (jax.random.normal(k_w, (out_dim, hidden), jnp.float32)
                       / jnp.sqrt(hidden))
        self.lora_A = jax.random.normal(k_a, (rank, hidden), jnp.float32) * 0.1
        self.lora_B = jnp.ones((out_dim, rank), jnp.float32) * 0.01
        self.scale = alpha / rank
        # Static preprocessing (once per model): bf16 cast + pad + scale fold.
        self._prep = prepare_lora_operands(
            self.weight.T,                    # [H_in, H_out]
            self.lora_A.T,                    # [H_in, r]
            self.lora_B.T * self.scale,       # [r, H_out], scale folded
        )
        # TODO(synk): lora_dropout is identity at eval; stochastic (training)
        # dropout is not implemented in the kernel.

    def __call__(self, inputs_embeds=None, **_):
        B, S, H = inputs_embeds.shape
        x2d = inputs_embeds.reshape(B * S, H)
        out2d = lora_linear_prepared(x2d, self._prep,
                                     out_dtype=inputs_embeds.dtype)
        return out2d.reshape(B, S, -1)


class EfficientLoRASaver:
    """JAX mirror of the PyTorch wrapper: forward delegates to the model;
    state_dict exposes only the LoRA adapter tensors."""

    def __init__(self, model):
        self.model = model

    def __call__(self, input_ids=None, past_key_values=None,
                 attention_mask=None, token_type_ids=None, head_mask=None,
                 inputs_embeds=None, labels=None, use_cache=None,
                 output_attentions=None, output_hidden_states=None,
                 return_dict=None, *args, **kwargs):
        return self.model(
            *args,
            inputs_embeds=inputs_embeds,
            input_ids=input_ids,
            past_key_values=past_key_values,
            attention_mask=attention_mask,
            token_type_ids=token_type_ids,
            head_mask=head_mask,
            labels=labels,
            use_cache=use_cache,
            output_attentions=output_attentions,
            output_hidden_states=output_hidden_states,
            return_dict=return_dict,
            **kwargs,
        )

    def state_dict(self):
        return {
            "model.lora.lora_A.weight": self.model.lora_A,
            "model.lora.lora_B.weight": self.model.lora_B,
        }


if __name__ == "__main__":
    key = jax.random.PRNGKey(0)
    k_model, k_x = jax.random.split(key)

    B, S, H, H_OUT, R, ALPHA = 2, 8, 32, 32, 8, 16
    model = LoRAModel(hidden=H, out_dim=H_OUT, rank=R, alpha=ALPHA, key=k_model)
    saver = EfficientLoRASaver(model)

    x = jax.random.normal(k_x, (B, S, H), jnp.float32)

    out = saver(inputs_embeds=x)
    out = jax.block_until_ready(out)

    # Pure-JAX reference with the same bf16 operands / f32 accumulation as the
    # kernel path (operands are cast to bf16 for MXU throughput).
    cdt = jnp.bfloat16
    x2d = x.reshape(B * S, H).astype(cdt)
    w_t = model.weight.T.astype(cdt)
    a_t = model.lora_A.T.astype(cdt)
    b_t = (model.lora_B.T * model.scale).astype(cdt)
    base = jnp.dot(x2d, w_t, preferred_element_type=jnp.float32)
    xa = jnp.dot(x2d, a_t, preferred_element_type=jnp.float32)
    lora = jnp.dot(xa.astype(cdt), b_t, preferred_element_type=jnp.float32)
    ref = (base + lora).astype(x.dtype).reshape(B, S, H_OUT)

    assert out.shape == (B, S, H_OUT)
    assert jnp.allclose(out, ref, atol=1e-2, rtol=1e-2), (
        float(jnp.max(jnp.abs(out - ref))))

    print("KERNEL_OK")
</pallas_src>

<mosaic_0001>
module attributes {stable_mosaic.version = 11 : i64} {
  func.func @_lora_linear_kernel(%arg0: i32, %arg1: i32, %arg2: i32, %arg3: memref<16x128xbf16, #tpu.memory_space<vmem>>, %arg4: memref<128x128xbf16, #tpu.memory_space<vmem>>, %arg5: memref<16x128xbf16, #tpu.memory_space<vmem>>, %arg6: memref<128x128xbf16, #tpu.memory_space<vmem>>, %arg7: memref<16x128xf32, #tpu.memory_space<vmem>>, %arg8: memref<16x128xf32, #tpu.memory_space<vmem>>) attributes {dimension_semantics = [#tpu.dimension_semantics<parallel>, #tpu.dimension_semantics<parallel>, #tpu.dimension_semantics<arbitrary>], iteration_bounds = array<i64: 1, 1, 1>, scalar_prefetch = 0 : i64, scratch_operands = 1 : i64, tpu.core_type = #tpu.core_type<tc>, window_params = [{transform_indices = @transform_0, window_bounds = array<i64: 16, 128>}, {transform_indices = @transform_1, window_bounds = array<i64: 128, 128>}, {transform_indices = @transform_2, window_bounds = array<i64: 16, 128>}, {transform_indices = @transform_3, window_bounds = array<i64: 128, 128>}, {transform_indices = @transform_4, window_bounds = array<i64: 16, 128>}]} {
    %c0 = arith.constant 0 : index
    %c0_0 = arith.constant 0 : index
    %0 = vector.load %arg3[%c0, %c0_0] : memref<16x128xbf16, #tpu.memory_space<vmem>>, vector<16x128xbf16>
    %c0_1 = arith.constant 0 : index
    %c0_2 = arith.constant 0 : index
    %1 = vector.load %arg4[%c0_1, %c0_2] : memref<128x128xbf16, #tpu.memory_space<vmem>>, vector<128x128xbf16>
    %cst = arith.constant dense<0.000000e+00> : vector<16x128xf32>
    %2 = tpu.matmul %0, %1, %cst {dimension_numbers = #tpu.dot_dimension_numbers<[1], [0], [0], [1], [0, 0, 1, 1], [], []>} : vector<16x128xbf16>, vector<128x128xbf16>, vector<16x128xf32> -> vector<16x128xf32>
    %c0_i32 = arith.constant 0 : i32
    %3 = arith.cmpi eq, %arg2, %c0_i32 : i32
    %4 = arith.extui %3 : i1 to i32
    %c0_i32_3 = arith.constant 0 : i32
    %5 = arith.cmpi ne, %4, %c0_i32_3 : i32
    scf.if %5 {
      %c0_8 = arith.constant 0 : index
      %c0_9 = arith.constant 0 : index
      %12 = vector.load %arg8[%c0_8, %c0_9] : memref<16x128xf32, #tpu.memory_space<vmem>>, vector<16x128xf32>
      tpu.vector_store %arg8[%c0_8, %c0_9], %2 {strides = array<i32>} : memref<16x128xf32, #tpu.memory_space<vmem>>, vector<16x128xf32>,
    } else {
    }
    %c0_i32_4 = arith.constant 0 : i32
    %6 = arith.cmpi sgt, %arg2, %c0_i32_4 : i32
    %7 = arith.extui %6 : i1 to i32
    %c0_i32_5 = arith.constant 0 : i32
    %8 = arith.cmpi ne, %7, %c0_i32_5 : i32
    scf.if %8 {
      %c0_8 = arith.constant 0 : index
      %c0_9 = arith.constant 0 : index
      %12 = vector.load %arg8[%c0_8, %c0_9] : memref<16x128xf32, #tpu.memory_space<vmem>>, vector<16x128xf32>
      %13 = arith.addf %12, %2 : vector<16x128xf32>
      %c0_10 = arith.constant 0 : index
      %c0_11 = arith.constant 0 : index
      %14 = vector.load %arg8[%c0_10, %c0_11] : memref<16x128xf32, #tpu.memory_space<vmem>>, vector<16x128xf32>
      tpu.vector_store %arg8[%c0_10, %c0_11], %13 {strides = array<i32>} : memref<16x128xf32, #tpu.memory_space<vmem>>, vector<16x128xf32>,
    } else {
    }
    %c0_i32_6 = arith.constant 0 : i32
    %9 = arith.cmpi eq, %arg2, %c0_i32_6 : i32
    %10 = arith.extui %9 : i1 to i32
    %c0_i32_7 = arith.constant 0 : i32
    %11 = arith.cmpi ne, %10, %c0_i32_7 : i32
    scf.if %11 {
      %c0_8 = arith.constant 0 : index
      %c0_9 = arith.constant 0 : index
      %12 = vector.load %arg5[%c0_8, %c0_9] : memref<16x128xbf16, #tpu.memory_space<vmem>>, vector<16x128xbf16>
      %c0_10 = arith.constant 0 : index
      %c0_11 = arith.constant 0 : index
      %13 = vector.load %arg6[%c0_10, %c0_11] : memref<128x128xbf16, #tpu.memory_space<vmem>>, vector<128x128xbf16>
      %cst_12 = arith.constant dense<0.000000e+00> : vector<16x128xf32>
      %14 = tpu.matmul %12, %13, %cst_12 {dimension_numbers = #tpu.dot_dimension_numbers<[1], [0], [0], [1], [0, 0, 1, 1], [], []>} : vector<16x128xbf16>, vector<128x128xbf16>, vector<16x128xf32> -> vector<16x128xf32>
      %c0_13 = arith.constant 0 : index
      %c0_14 = arith.constant 0 : index
      %15 = vector.load %arg8[%c0_13, %c0_14] : memref<16x128xf32, #tpu.memory_space<vmem>>, vector<16x128xf32>
      %16 = arith.addf %15, %14 : vector<16x128xf32>
      %c0_15 = arith.constant 0 : index
      %c0_16 = arith.constant 0 : index
      %17 = vector.load %arg7[%c0_15, %c0_16] : memref<16x128xf32, #tpu.memory_space<vmem>>, vector<16x128xf32>
      tpu.vector_store %arg7[%c0_15, %c0_16], %16 {strides = array<i32>} : memref<16x128xf32, #tpu.memory_space<vmem>>, vector<16x128xf32>,
    } else {
    }
    return
  }
  func.func @transform_0(%arg0: i32, %arg1: i32, %arg2: i32) -> (i32, i32) {
    %c0_i32 = arith.constant 0 : i32
    return %arg0, %arg2 : i32, i32
  }
  func.func @transform_1(%arg0: i32, %arg1: i32, %arg2: i32) -> (i32, i32) {
    %c0_i32 = arith.constant 0 : i32
    return %arg2, %arg1 : i32, i32
  }
  func.func @transform_2(%arg0: i32, %arg1: i32, %arg2: i32) -> (i32, i32) {
    %c0_i32 = arith.constant 0 : i32
    %c0_i32_0 = arith.constant 0 : i32
    return %arg0, %c0_i32 : i32, i32
  }
  func.func @transform_3(%arg0: i32, %arg1: i32, %arg2: i32) -> (i32, i32) {
    %c0_i32 = arith.constant 0 : i32
    %c0_i32_0 = arith.constant 0 : i32
    return %c0_i32, %arg1 : i32, i32
  }
  func.func @transform_4(%arg0: i32, %arg1: i32, %arg2: i32) -> (i32, i32) {
    %c0_i32 = arith.constant 0 : i32
    return %arg0, %arg1 : i32, i32
  }
}

</mosaic_0001>

<bundles_post_ra>
// kernel: tpu_custom_call.1
= control target key start
LH: loop header
LB: loop body
LE: loop exit
PB: predicated region body
PF: predicated region fallthrough
CT: control target
= control target key end

     0   :  { %9 = vsyncpa [#allocation4], 0  ;;  %s691_s0 = inlined_call_operand.hbm [shape: bf16[16,128], index: 0, kind: input, shape index: {}]   ;;  %s692_s1 = inlined_call_operand.hbm [shape: bf16[128,128], index: 1, kind: input, shape index: {}]   ;;  %s693_s2 = inlined_call_operand.hbm [shape: bf16[16,128], index: 2, kind: input, shape index: {}]   ;;  %s694_s3 = inlined_call_operand.hbm [shape: bf16[128,128], index: 3, kind: input, shape index: {}]   ;;  %s695_s4 = inlined_call_operand.hbm [shape: f32[16,128], index: 4, kind: output, shape index: {}]  }
   0x1   :  { %10 = vsyncpa [#allocation7], 0 }
   0x2   :  { %11 = vsyncpa [#allocation10], 0 }
   0x3   :  { %12 = vsyncpa [#allocation5], 0  ;;  %s569_s15 = smov [#allocation6]   ;;  %s570_s17 = smov [#allocation3]  }
   0x4   :  { %s30_s16 = sshll.u32 %s569_s15, 4  ;;  %s18_s18 = sshll.u32 %s570_s17, 4  ;;  %s31_s16 = int_to_ptr.vmem [resolvable:$true] %s30_s16  ;;  %s605_s18 = int_to_ptr.vmem [resolvable:$true] %s18_s18 }
   0x5   :  { %s451_s21 = scalar_lea.hbm %s692_s1, 1024 }
   0x6   :  { %p452_p0 = scmp.ne.s32.totalorder %s692_s1, %s451_s21  ;;  %p455_p1 = scmp.lt.u32.totalorder %s451_s21, %s692_s1 }
   0x8   :  { %p457_p2 = pnand %p455_p1, %p452_p0 }
   0xa   :  { %460 = shalt.err (!%p457_p2)
}
   0xb   :  { %s461_s26 = scalar_lea.vmem %s31_s16, 1024  ;;  %p466_p4 = scmp.lt.s32.totalorder %s31_s16, %s31_s16 }
   0xc   :  { %p462_p3 = scmp.ne.s32.totalorder %s31_s16, %s461_s26  ;;  %p467_p5 = scmp.lt.s32.totalorder %s461_s26, %s461_s26 }
   0xe   :  { %p468_p6 = por %p467_p5, %p466_p4 }
  0x10   :  { %p469_p7 = pnand %p468_p6, %p462_p3 }
  0x12   :  { %472 = shalt.err (!%p469_p7)
}
  0x13   :  { %s571_s27 = smov 64   ;;  %s572_s28 = smov 4  }
  0x14   :  { %36 = dma.hbm_to_vmem [thread:$0]  %s692_s1, 1024, %s31_s16, [#allocation7], %s571_s27, %s571_s27, %s572_s28  }
  0x15   :  { %s473_s7 = scalar_lea.hbm %s691_s0, 128 }
  0x16   :  { %p474_p8 = scmp.ne.s32.totalorder %s691_s0, %s473_s7  ;;  %p477_p9 = scmp.lt.u32.totalorder %s473_s7, %s691_s0 }
  0x18   :  { %p479_p10 = pnand %p477_p9, %p474_p8 }
  0x1a   :  { %482 = shalt.err (!%p479_p10)
}
  0x1b   :  { %s483_s12 = scalar_lea.vmem %s605_s18, 128  ;;  %p488_p12 = scmp.lt.s32.totalorder %s605_s18, %s605_s18 }
  0x1c   :  { %p484_p11 = scmp.ne.s32.totalorder %s605_s18, %s483_s12  ;;  %p489_p13 = scmp.lt.s32.totalorder %s483_s12, %s483_s12 }
  0x1e   :  { %p490_p0 = por %p489_p13, %p488_p12 }
  0x20   :  { %p491_p1 = pnand %p490_p0, %p484_p11 }
  0x22   :  { %494 = shalt.err (!%p491_p1)
}
  0x23   :  { %24 = dma.hbm_to_vmem [thread:$0]  %s691_s0, 128, %s605_s18, [#allocation4], %s571_s27, %s571_s27, %s572_s28  }
  0x24   :  { %s573_s14 = smov [#allocation8]   ;;  %s574_s16 = smov [#allocation9]  }
  0x25   :  { %s42_s15 = sshll.u32 %s573_s14, 4  ;;  %s54_s17 = sshll.u32 %s574_s16, 4  ;;  %s43_s15 = int_to_ptr.vmem [resolvable:$true] %s42_s15  ;;  %s642_s17 = int_to_ptr.vmem [resolvable:$true] %s54_s17 }
  0x26   :  { %s495_s21 = scalar_lea.hbm %s693_s2, 128 }
  0x27   :  { %p496_p2 = scmp.ne.s32.totalorder %s693_s2, %s495_s21  ;;  %p499_p3 = scmp.lt.u32.totalorder %s495_s21, %s693_s2 }
  0x29   :  { %p501_p4 = pnand %p499_p3, %p496_p2 }
  0x2b   :  { %504 = shalt.err (!%p501_p4)
}
  0x2c   :  { %s505_s0 = scalar_lea.vmem %s43_s15, 128  ;;  %p510_p6 = scmp.lt.s32.totalorder %s43_s15, %s43_s15 }
  0x2d   :  { %p506_p5 = scmp.ne.s32.totalorder %s43_s15, %s505_s0  ;;  %p511_p7 = scmp.lt.s32.totalorder %s505_s0, %s505_s0 }
  0x2f   :  { %p512_p8 = por %p511_p7, %p510_p6 }
  0x31   :  { %p513_p9 = pnand %p512_p8, %p506_p5 }
  0x33   :  { %516 = shalt.err (!%p513_p9)
}
  0x34   :  { %48 = dma.hbm_to_vmem [thread:$0]  %s693_s2, 128, %s43_s15, [#allocation7], %s571_s27, %s571_s27, %s572_s28  }
  0x35   :  { %s517_s5 = scalar_lea.hbm %s694_s3, 1024 }
  0x36   :  { %p518_p10 = scmp.ne.s32.totalorder %s694_s3, %s517_s5  ;;  %p521_p11 = scmp.lt.u32.totalorder %s517_s5, %s694_s3 }
  0x38   :  { %p523_p12 = pnand %p521_p11, %p518_p10 }
  0x3a   :  { %526 = shalt.err (!%p523_p12)
}
  0x3b   :  { %s527_s10 = scalar_lea.vmem %s642_s17, 1024  ;;  %p532_p0 = scmp.lt.s32.totalorder %s642_s17, %s642_s17 }
  0x3c   :  { %p528_p13 = scmp.ne.s32.totalorder %s642_s17, %s527_s10  ;;  %p533_p1 = scmp.lt.s32.totalorder %s527_s10, %s527_s10 }
  0x3e   :  { %p534_p2 = por %p533_p1, %p532_p0 }
  0x40   :  { %p535_p3 = pnand %p534_p2, %p528_p13 }
  0x42   :  { %538 = shalt.err (!%p535_p3)
}
  0x43   :  { %60 = dma.hbm_to_vmem [thread:$0]  %s694_s3, 1024, %s642_s17, [#allocation10], %s571_s27, %s571_s27, %s572_s28  }
  0x44   :  { %561 = dma.done.wait [#allocation4], 128  }
  0x45   :  { %562 = vsyncadd [#allocation4], 4294967168 }
  0x46   :  { %563 = dma.done.wait [#allocation7], 1152  }
  0x47   :  { %564 = vsyncadd [#allocation7], 4294966144 }
  0x48   :  { %565 = dma.done.wait [#allocation10], 1024  }
  0x49   :  { %566 = vsyncadd [#allocation10], 4294966272  ;;  %v575_v0 = vmov 0.0   ;;  %vm576_vm0 = vmmov 0   ;;  %v433_v1 = vld [vmem:[#allocation6] sm:$0xff]   ;;  %v434_v2 = vld [vmem:[#allocation9] sm:$0xff]  }
  0x4a   :  { %380 = vmatprep.subr.bf16.mxu1 %v575_v0  ;;  %400 = vmatprep.subr.bf16.mxu0 %v575_v0  ;;  %v435_v3 = vld [vmem:[#allocation6 + $0x8] sm:$0xff]   ;;  %v436_v4 = vld [vmem:[#allocation9 + $0x8] sm:$0xff]   ;;  %v438_v6 = vld [vmem:[#allocation9 + $0x10] sm:$0xff]   ;;  %s577_s3 = smov [#allocation11]  }
  0x4b   :  { %396 = vmatprep.mubr.msk.bf16.mxu1 %vm576_vm0, %v575_v0  ;;  %416 = vmatprep.mubr.msk.bf16.mxu0 %vm576_vm0, %v575_v0  ;;  %v437_v5 = vld [vmem:[#allocation6 + $0x10] sm:$0xff]   ;;  %v439_v7 = vld [vmem:[#allocation6 + $0x18] sm:$0xff]   ;;  %v440_v8 = vld [vmem:[#allocation9 + $0x18] sm:$0xff]   ;;  %s330_s27 = sshll.u32 %s577_s3, 4  ;;  %s331_s27 = int_to_ptr.vmem [resolvable:$true] %s330_s27 }
  0x4c   :  { %381 = vmatpush3.bf16.msra.mxu1 %v433_v1  ;;  %401 = vmatpush3.bf16.msra.mxu0 %v434_v2  ;;  %v441_v9 = vld [vmem:[#allocation6 + $0x20] sm:$0xff]   ;;  %v442_v10 = vld [vmem:[#allocation9 + $0x20] sm:$0xff]   ;;  %v444_v12 = vld [vmem:[#allocation9 + $0x28] sm:$0xff]   ;;  %s539_s28 = scalar_lea.vmem %s331_s27, 256  ;;  %p544_p5 = scmp.lt.s32.totalorder %s331_s27, %s331_s27 }
  0x4d   :  { %382 = vmatprep.subr.bf16.mxu1 %v575_v0  ;;  %402 = vmatprep.subr.bf16.mxu0 %v575_v0  ;;  %v443_v11 = vld [vmem:[#allocation6 + $0x28] sm:$0xff]   ;;  %v445_v13 = vld [vmem:[#allocation6 + $0x30] sm:$0xff]   ;;  %v446_v14 = vld [vmem:[#allocation9 + $0x30] sm:$0xff]   ;;  %p540_p4 = scmp.ne.s32.totalorder %s331_s27, %s539_s28  ;;  %p545_p6 = scmp.lt.s32.totalorder %s539_s28, %s539_s28 }
  0x4e   :  { %v447_v15 = vld [vmem:[#allocation6 + $0x38] sm:$0xff]   ;;  %v448_v16 = vld [vmem:[#allocation9 + $0x38] sm:$0xff]  }
  0x4f   :  { %v449_v17 = vld [vmem:[#allocation3] sm:$0xff]   ;;  %v450_v18 = vld [vmem:[#allocation8] sm:$0xff]   ;;  %p546_p7 = por %p545_p6, %p544_p5 }
  0x50   :  { %383 = vmatpush3.bf16.msra.mxu1 %v435_v3  ;;  %403 = vmatpush3.bf16.msra.mxu0 %v436_v4 }
  0x51   :  { %384 = vmatprep.subr.bf16.mxu1 %v575_v0  ;;  %404 = vmatprep.subr.bf16.mxu0 %v575_v0  ;;  %p547_p8 = pnand %p546_p7, %p540_p4 }
  0x54   :  { %385 = vmatpush3.bf16.msra.mxu1 %v437_v5  ;;  %405 = vmatpush3.bf16.msra.mxu0 %v438_v6 }
  0x55   :  { %386 = vmatprep.subr.bf16.mxu1 %v575_v0  ;;  %406 = vmatprep.subr.bf16.mxu0 %v575_v0 }
  0x58   :  { %387 = vmatpush3.bf16.msra.mxu1 %v439_v7  ;;  %407 = vmatpush3.bf16.msra.mxu0 %v440_v8 }
  0x59   :  { %388 = vmatprep.subr.bf16.mxu1 %v575_v0  ;;  %408 = vmatprep.subr.bf16.mxu0 %v575_v0 }
  0x5c   :  { %389 = vmatpush3.bf16.msra.mxu1 %v441_v9  ;;  %409 = vmatpush3.bf16.msra.mxu0 %v442_v10 }
  0x5d   :  { %390 = vmatprep.subr.bf16.mxu1 %v575_v0  ;;  %410 = vmatprep.subr.bf16.mxu0 %v575_v0 }
  0x60   :  { %391 = vmatpush3.bf16.msra.mxu1 %v443_v11  ;;  %411 = vmatpush3.bf16.msra.mxu0 %v444_v12 }
  0x61   :  { %392 = vmatprep.subr.bf16.mxu1 %v575_v0  ;;  %412 = vmatprep.subr.bf16.mxu0 %v575_v0 }
  0x64   :  { %393 = vmatpush3.bf16.msra.mxu1 %v445_v13  ;;  %413 = vmatpush3.bf16.msra.mxu0 %v446_v14 }
  0x65   :  { %394 = vmatprep.subr.bf16.mxu1 %v575_v0  ;;  %414 = vmatprep.subr.bf16.mxu0 %v575_v0 }
  0x68   :  { %395 = vmatpush3.bf16.msra.mxu1 %v447_v15  ;;  %415 = vmatpush3.bf16.msra.mxu0 %v448_v16 }
  0x6b   :  { %397 = vmatmul.mubr.bf16.vlgmr.msra.gmra.mrb[0].mxu1 %v449_v17  ;;  %417 = vmatmul.mubr.bf16.vlgmr.msra.gmra.mrb[0].mxu0 %v450_v18 }
 0x13e   :  { %v180_v19 = vpop.f32.mrb[0].mxu1  ;;  %v312_v20 = vpop.f32.mrb[0].mxu0 }
 0x13f   :  { %v398_v21 = vpop.f32.mrb[1].mxu1  ;;  %v321_v22 = vadd.f32 %v312_v20, %v180_v19  ;;  %v418_v23 = vpop.f32.mrb[1].mxu0 }
 0x140   :  { %v183_v24 = vpop.f32.mrb[2].mxu1  ;;  %v315_v25 = vpop.f32.mrb[2].mxu0 }
 0x141   :  { %v399_v26 = vpop.f32.mrb[3].mxu1  ;;  %323 = vst [vmem:[#allocation11] sm:$0xff] %v321_v22  ;;  %v322_v27 = vadd.f32 %v315_v25, %v183_v24  ;;  %v419_v28 = vpop.f32.mrb[3].mxu0 }
 0x143   :  { %324 = vst [vmem:[#allocation11 + $0x8] sm:$0xff] %v322_v27 }
 0x144   :  { %550 = shalt.err (!%p547_p8)
}
 0x145   :  { %s551_s13 = scalar_lea.hbm %s695_s4, 256 }
 0x146   :  { %p552_p9 = scmp.ne.s32.totalorder %s695_s4, %s551_s13  ;;  %p555_p10 = scmp.lt.u32.totalorder %s551_s13, %s695_s4 }
 0x148   :  { %p557_p11 = pnand %p555_p10, %p552_p9 }
 0x14a   :  { %560 = shalt.err (!%p557_p11)
}
 0x14b   :  { %s578_s19 = smov 128   ;;  %s579_s20 = smov 8  }
 0x14c   :  { %336 = dma.vmem_to_hbm [thread:$0]  %s331_s27, 256, %s695_s4, [#allocation5], %s578_s19, %s578_s19, %s579_s20  }
 0x14d   :  { %567 = dma.done.wait [#allocation5], 256  }
 0x14e   :  { %568 = vsyncadd [#allocation5], 4294967040 }
 0x14f   :  { %340 = vsyncpa [#allocation4], 1 }
 0x150   :  { %341 = vsyncpa [#allocation7], 1 }
 0x151   :  { %342 = vsyncpa [#allocation10], 1 }
 0x152   :  { %343 = vsyncpa [#allocation5], 1 }

</bundles_post_ra>
